<compile_context>
chip_gen: v7x
topology: tpu7x:2x2x1
jax: 0.10.0
libtpu: 0.0.40
codegen_flags: <defaults>
</compile_context>

<pallas_src>
import jax
import jax.numpy as jnp
from jax.experimental import pallas as pl
from jax.experimental.pallas import tpu as pltpu


def _round_up(x, m):
    return ((x + m - 1) // m) * m


# ---------------------------------------------------------------------------
# Pallas kernels
# ---------------------------------------------------------------------------
def _proj_kernel_resident(a_ref, w_ref, b_ref, o_ref):
    # W and bias blocks are constant across the 1-D M grid -> VMEM-resident.
    o_ref[...] = (jnp.dot(a_ref[...], w_ref[...],
                          preferred_element_type=jnp.float32)
                  + b_ref[...]).astype(o_ref.dtype)


def _proj_kernel_tiled(a_ref, w_ref, b_ref, o_ref, acc_ref):
    @pl.when(pl.program_id(2) == 0)
    def _():
        # Fold the bias into the accumulator init (no separate epilogue add).
        acc_ref[...] = jnp.zeros_like(acc_ref) + b_ref[...]

    acc_ref[...] += jnp.dot(a_ref[...], w_ref[...],
                            preferred_element_type=jnp.float32)

    @pl.when(pl.program_id(2) == pl.num_programs(2) - 1)
    def _():
        o_ref[...] = acc_ref[...].astype(o_ref.dtype)


# ---------------------------------------------------------------------------
# Tile selection helpers (trace-time Python, cheap)
# ---------------------------------------------------------------------------
def _pick_divisor_tile(n, max_tile):
    """Largest multiple of 128 that divides n and is <= max_tile.

    Falls back to the full extent n (always a legal block) so we never pad."""
    if n <= max_tile:
        return n
    t = (max_tile // 128) * 128
    for d in range(t, 127, -128):
        if n % d == 0:
            return d
    return n


def _pick_tm_resident(M, K, N, vmem_budget, tm_max):
    """Pick the M tile for the resident-W path.

    Constraint: tm % 8 == 0 or tm == M (sublane rule).  Prefer a divisor of M
    (no partial block); otherwise the cdiv grid masks the partial last block."""
    w_bytes = K * N * 2 + N * 4
    per_row = 2 * (K * 2 + N * 4)          # double-buffered bf16 A row + f32 out row
    cap = max((vmem_budget - w_bytes) // per_row, 8)
    desired = int(min(tm_max, cap))
    if M <= desired:
        if M > 256:
            # Split into (at least) 2 tiles so both v7x TensorCores get work.
            return min(_round_up((M + 1) // 2, 8), M)
        return M
    desired = max(desired - desired % 8, 8)
    for d in range(desired, max(desired // 2, 8) - 1, -8):
        if M % d == 0:
            return d
    return desired


# ---------------------------------------------------------------------------
# Wrappers around pallas_call
# ---------------------------------------------------------------------------
_RESIDENT_W_LIMIT = 8 * 1024 * 1024       # keep W VMEM-resident below this (bytes)
_VMEM_BUDGET = 24 * 1024 * 1024           # double-buffered working-set target


def _matmul_resident(a, w, b2, *, tm_max):
    M, K = a.shape
    _, N = w.shape
    tm = _pick_tm_resident(M, K, N, _VMEM_BUDGET, tm_max)
    grid_m = pl.cdiv(M, tm)

    need = 2 * (tm * K * 2 + tm * N * 4) + K * N * 2 + N * 4
    vmem_limit = int(min(max(2 * need, 32 * 2**20), 48 * 2**20))

    return pl.pallas_call(
        _proj_kernel_resident,
        out_shape=jax.ShapeDtypeStruct((M, N), jnp.float32),
        grid=(grid_m,),
        in_specs=[
            pl.BlockSpec((tm, K), lambda i: (i, 0)),
            pl.BlockSpec((K, N), lambda i: (0, 0)),    # VMEM-resident across M
            pl.BlockSpec((1, N), lambda i: (0, 0)),    # VMEM-resident bias
        ],
        out_specs=pl.BlockSpec((tm, N), lambda i: (i, 0)),
        compiler_params=pltpu.CompilerParams(
            dimension_semantics=("parallel",),
            vmem_limit_bytes=vmem_limit),
    )(a, w, b2)


def _matmul_tiled(a, w, b2, *, tiled_tm, tn_max, tk_max):
    M, K = a.shape
    _, N = w.shape
    tk = _pick_divisor_tile(K, tk_max)     # divides K (or equals K) -> no K pad
    tn = _pick_divisor_tile(N, tn_max)     # divides N (or equals N) -> no N pad
    tm = M if M <= tiled_tm else max(8, tiled_tm - tiled_tm % 8)
    grid = (pl.cdiv(M, tm), N // tn, K // tk)

    need = 2 * (tm * tk * 2 + tk * tn * 2 + tm * tn * 4) + tm * tn * 4 + tn * 4
    vmem_limit = int(min(max(2 * need, 32 * 2**20), 48 * 2**20))

    return pl.pallas_call(
        _proj_kernel_tiled,
        out_shape=jax.ShapeDtypeStruct((M, N), jnp.float32),
        grid=grid,
        in_specs=[
            pl.BlockSpec((tm, tk), lambda i, j, k: (i, k)),
            pl.BlockSpec((tk, tn), lambda i, j, k: (k, j)),
            pl.BlockSpec((1, tn), lambda i, j, k: (0, j)),
        ],
        out_specs=pl.BlockSpec((tm, tn), lambda i, j, k: (i, j)),
        scratch_shapes=[pltpu.VMEM((tm, tn), jnp.float32)],
        compiler_params=pltpu.CompilerParams(
            dimension_semantics=("parallel", "parallel", "arbitrary"),
            vmem_limit_bytes=vmem_limit),
    )(a, w, b2)


def matmul_bias_pallas(a, w, bias, *, tm_max=1024, force_tiled=False,
                       tiled_tm=256, tn_max=512, tk_max=2048):
    """a: (M, K), w: (K, N), bias: (N,) -> (M, N) float32.

    Inputs are fed to the MXU in bf16; accumulation and bias stay f32."""
    M, K = a.shape
    K2, N = w.shape
    assert K == K2 and bias.shape == (N,)
    a = a.astype(jnp.bfloat16)
    w = w.astype(jnp.bfloat16)
    b2 = bias.astype(jnp.float32).reshape(1, N)

    if not force_tiled and K * N * 2 <= _RESIDENT_W_LIMIT:
        return _matmul_resident(a, w, b2, tm_max=tm_max)
    return _matmul_tiled(a, w, b2, tiled_tm=tiled_tm, tn_max=tn_max,
                         tk_max=tk_max)


# ---------------------------------------------------------------------------
# Layout plumbing: patch extraction as a SINGLE fused reshape/transpose.
# Flatten order of a patch is (ph, pw, c), matching the weight layout below.
# ---------------------------------------------------------------------------
def _extract_patches_nchw(x, P):
    """(B, C, H, W) -> ((B*Hp*Wp, P*P*C), (Hp, Wp))  [fuses NCHW->NHWC + patchify]."""
    B, C, H, W = x.shape
    Hp, Wp = H // P, W // P
    p = x.reshape(B, C, Hp, P, Wp, P)
    p = jnp.transpose(p, (0, 2, 4, 3, 5, 1))          # (B, Hp, Wp, ph, pw, C)
    return p.reshape(B * Hp * Wp, P * P * C), (Hp, Wp)


def _extract_patches_nhwc(x, P):
    """(B, H, W, C) -> ((B*Hp*Wp, P*P*C), (Hp, Wp))."""
    B, H, W, C = x.shape
    Hp, Wp = H // P, W // P
    p = x.reshape(B, Hp, P, Wp, P, C)
    p = jnp.transpose(p, (0, 1, 3, 2, 4, 5))          # (B, Hp, Wp, ph, pw, C)
    return p.reshape(B * Hp * Wp, P * P * C), (Hp, Wp)


# ---------------------------------------------------------------------------
# ImgEmbed module
# ---------------------------------------------------------------------------
class ImgEmbedPallas:
    """JAX/Pallas version of the PyTorch ImgEmbed module."""

    def __init__(self, img_size=224, patch_size=16, in_chans=3, embed_dim=768,
                 layerNum=1, key=None):
        self.img_size = img_size
        self.patch_size = patch_size
        self.num_patches = (img_size // patch_size) ** 2
        self.embed_dim = embed_dim
        key = jax.random.PRNGKey(0) if key is None else key

        self.weights_oihw = []     # PyTorch (O, I, kH, kW) f32 layout (for the ref)
        self.weights_k_by_n = []   # kernel layout (P*P*Cin, Dout) in bf16, built once
        self.biases = []           # f32
        chans = in_chans
        for _ in range(layerNum):
            key, kw, kb = jax.random.split(key, 3)
            fan_in = chans * patch_size * patch_size
            bound = 1.0 / (fan_in ** 0.5)
            w = jax.random.uniform(kw, (embed_dim, chans, patch_size, patch_size),
                                   minval=-bound, maxval=bound, dtype=jnp.float32)
            b = jax.random.uniform(kb, (embed_dim,), minval=-bound, maxval=bound,
                                   dtype=jnp.float32)
            self.weights_oihw.append(w)
            # (O, I, P, P) -> (P, P, I, O) -> (P*P*I, O): matches the (ph, pw, c)
            # patch-flatten order.  Cast to bf16 once here, never in the hot path.
            self.weights_k_by_n.append(
                jnp.transpose(w, (2, 3, 1, 0)).reshape(fan_in, embed_dim)
                .astype(jnp.bfloat16))
            self.biases.append(b)
            chans = embed_dim

    def __call__(self, x):
        assert x.ndim == 4, "Only accept tensor input with dimension 4."
        B, C, H, W = x.shape
        assert H == self.img_size and W == self.img_size, (
            f"Input image size ({H}*{W}) doesn't match model "
            f"({self.img_size}*{self.img_size}).")
        P = self.patch_size

        # Layer 1: patchify straight from NCHW (single fused layout pass).
        patches, (Hp, Wp) = _extract_patches_nchw(x, P)
        y = matmul_bias_pallas(patches, self.weights_k_by_n[0], self.biases[0])
        x = y.reshape(B, Hp, Wp, self.embed_dim)

        # proj2 layers (identity when layerNum == 1): intermediates stay NHWC.
        for w2d, b in zip(self.weights_k_by_n[1:], self.biases[1:]):
            patches, (Hp, Wp) = _extract_patches_nhwc(x, P)
            y = matmul_bias_pallas(patches, w2d, b)
            x = y.reshape(B, Hp, Wp, self.embed_dim)

        # == permute(0, 2, 3, 1).contiguous().view(B, -1, embed_dim) in PyTorch.
        return x.reshape(B, -1, self.embed_dim)


# ---------------------------------------------------------------------------
# Pure-JAX reference (real strided convs, f32) for validation.
# ---------------------------------------------------------------------------
def _conv_ref(x, w, b, stride):
    y = jax.lax.conv_general_dilated(
        x, w, window_strides=(stride, stride), padding="VALID",
        dimension_numbers=("NCHW", "OIHW", "NCHW"))
    return y + b[None, :, None, None]


def img_embed_ref(x, weights_oihw, biases, patch_size):
    for w, b in zip(weights_oihw, biases):
        x = _conv_ref(x, w, b, patch_size)
    B, D = x.shape[0], x.shape[1]
    return jnp.transpose(x, (0, 2, 3, 1)).reshape(B, -1, D)


if __name__ == "__main__":
    B, C, H, W = 2, 4, 16, 16
    patch, embed = 4, 32
    key = jax.random.PRNGKey(0)
    k_x, k_m, k_a, k_w, k_b = jax.random.split(key, 5)
    x = jax.random.normal(k_x, (B, C, H, W), dtype=jnp.float32)

    # --- layerNum = 1 (module default): proj2 is identity --------------------
    model = ImgEmbedPallas(img_size=H, patch_size=patch, in_chans=C,
                           embed_dim=embed, layerNum=1, key=k_m)
    y = jax.block_until_ready(model(x))
    assert y.shape == (B, model.num_patches, embed), y.shape
    y_ref = img_embed_ref(x, model.weights_oihw, model.biases, patch)
    # bf16 MXU inputs with f32 accumulation vs. the f32 conv reference.
    assert jnp.allclose(y, y_ref, atol=3e-2, rtol=3e-2), (
        "mismatch vs conv reference, max abs err = "
        f"{float(jnp.max(jnp.abs(y - y_ref)))}")

    # --- layerNum = 2 (non-empty proj2): spatial 16 -> 4 -> 1 -----------------
    model2 = ImgEmbedPallas(img_size=H, patch_size=patch, in_chans=C,
                            embed_dim=embed, layerNum=2, key=k_m)
    y2 = jax.block_until_ready(model2(x))
    assert y2.shape == (B, 1, embed), y2.shape
    y2_ref = img_embed_ref(x, model2.weights_oihw, model2.biases, patch)
    assert jnp.allclose(y2, y2_ref, atol=3e-2, rtol=3e-2), (
        "mismatch vs conv reference (layerNum=2), max abs err = "
        f"{float(jnp.max(jnp.abs(y2 - y2_ref)))}")

    # --- exercise the big-W 3-D tiled fallback path directly ------------------
    Mt, Kt, Nt = 80, 384, 256
    a_t = jax.random.normal(k_a, (Mt, Kt), dtype=jnp.float32)
    w_t = jax.random.normal(k_w, (Kt, Nt), dtype=jnp.float32) / (Kt ** 0.5)
    b_t = 0.1 * jax.random.normal(k_b, (Nt,), dtype=jnp.float32)
    out_t = jax.block_until_ready(
        matmul_bias_pallas(a_t, w_t, b_t, force_tiled=True,
                           tiled_tm=256, tn_max=128, tk_max=128))
    ref_t = a_t @ w_t + b_t[None, :]
    assert out_t.shape == (Mt, Nt), out_t.shape
    assert jnp.allclose(out_t, ref_t, atol=3e-2, rtol=3e-2), (
        "mismatch in tiled path, max abs err = "
        f"{float(jnp.max(jnp.abs(out_t - ref_t)))}")

    print("KERNEL_OK")
</pallas_src>

<mosaic_0001>
module attributes {stable_mosaic.version = 11 : i64} {
  func.func @_proj_kernel_resident(%arg0: i32, %arg1: memref<32x64xbf16, #tpu.memory_space<vmem>>, %arg2: memref<64x32xbf16, #tpu.memory_space<vmem>>, %arg3: memref<1x32xf32, #tpu.memory_space<vmem>>, %arg4: memref<32x32xf32, #tpu.memory_space<vmem>>) attributes {dimension_semantics = [#tpu.dimension_semantics<parallel>], iteration_bounds = array<i64: 1>, scalar_prefetch = 0 : i64, scratch_operands = 0 : i64, tpu.core_type = #tpu.core_type<tc>, window_params = [{transform_indices = @transform_0, window_bounds = array<i64: 32, 64>}, {pipeline_mode = #tpu.pipeline_mode<synchronous>, transform_indices = @transform_1, window_bounds = array<i64: 64, 32>}, {pipeline_mode = #tpu.pipeline_mode<synchronous>, transform_indices = @transform_2, window_bounds = array<i64: 1, 32>}, {transform_indices = @transform_3, window_bounds = array<i64: 32, 32>}]} {
    %c0 = arith.constant 0 : index
    %c0_0 = arith.constant 0 : index
    %0 = vector.load %arg1[%c0, %c0_0] : memref<32x64xbf16, #tpu.memory_space<vmem>>, vector<32x64xbf16>
    %c0_1 = arith.constant 0 : index
    %c0_2 = arith.constant 0 : index
    %1 = vector.load %arg2[%c0_1, %c0_2] : memref<64x32xbf16, #tpu.memory_space<vmem>>, vector<64x32xbf16>
    %cst = arith.constant dense<0.000000e+00> : vector<32x32xf32>
    %2 = tpu.matmul %0, %1, %cst {dimension_numbers = #tpu.dot_dimension_numbers<[1], [0], [0], [1], [0, 0, 1, 1], [], []>} : vector<32x64xbf16>, vector<64x32xbf16>, vector<32x32xf32> -> vector<32x32xf32>
    %c0_3 = arith.constant 0 : index
    %c0_4 = arith.constant 0 : index
    %3 = vector.load %arg3[%c0_3, %c0_4] : memref<1x32xf32, #tpu.memory_space<vmem>>, vector<1x32xf32>
    %4 = vector.broadcast %3 : vector<1x32xf32> to vector<32x32xf32>
    %5 = arith.addf %2, %4 : vector<32x32xf32>
    %c0_5 = arith.constant 0 : index
    %c0_6 = arith.constant 0 : index
    %6 = vector.load %arg4[%c0_5, %c0_6] : memref<32x32xf32, #tpu.memory_space<vmem>>, vector<32x32xf32>
    tpu.vector_store %arg4[%c0_5, %c0_6], %5 {strides = array<i32>} : memref<32x32xf32, #tpu.memory_space<vmem>>, vector<32x32xf32>,
    return
  }
  func.func @transform_0(%arg0: i32) -> (i32, i32) {
    %c0_i32 = arith.constant 0 : i32
    %c0_i32_0 = arith.constant 0 : i32
    return %arg0, %c0_i32 : i32, i32
  }
  func.func @transform_1(%arg0: i32) -> (i32, i32) {
    %c0_i32 = arith.constant 0 : i32
    %c0_i32_0 = arith.constant 0 : i32
    %c0_i32_1 = arith.constant 0 : i32
    return %c0_i32, %c0_i32_0 : i32, i32
  }
  func.func @transform_2(%arg0: i32) -> (i32, i32) {
    %c0_i32 = arith.constant 0 : i32
    %c0_i32_0 = arith.constant 0 : i32
    %c0_i32_1 = arith.constant 0 : i32
    return %c0_i32, %c0_i32_0 : i32, i32
  }
  func.func @transform_3(%arg0: i32) -> (i32, i32) {
    %c0_i32 = arith.constant 0 : i32
    %c0_i32_0 = arith.constant 0 : i32
    return %arg0, %c0_i32 : i32, i32
  }
}

</mosaic_0001>

<bundles_post_ra>
// kernel: tpu_custom_call.1
= control target key start
LH: loop header
LB: loop body
LE: loop exit
PB: predicated region body
PF: predicated region fallthrough
CT: control target
= control target key end

     0   :  { %vm69_vm0 = vcmask 523264   ;;  %s262_s0 = inlined_call_operand.vmem [shape: bf16[32,64], index: 0, kind: input, shape index: {}]   ;;  %s263_s1 = inlined_call_operand.vmem [shape: bf16[64,32], index: 1, kind: input, shape index: {}]   ;;  %s264_s2 = inlined_call_operand.vmem [shape: f32[1,32], index: 2, kind: input, shape index: {}]   ;;  %s265_s3 = inlined_call_operand.hbm [shape: f32[32,32], index: 3, kind: output, shape index: {}]  }
   0x1   :  { %v176_v0 = vld [vmem:[%s263_s1] sm:$0xff]   ;;  %v177_v1 = vld [vmem:[%s263_s1 + $0x8] sm:$0xff]   ;;  %v178_v2 = vld [vmem:[%s263_s1 + $0x10] sm:$0xff]  }
   0x2   :  { %161 = vmatprep.subr.bf16.mxu0 %v176_v0  ;;  %v180_v3 = vld [vmem:[%s262_s0] sm:$0xff]  }
   0x3   :  { %162 = vmatpush3.bf16.msra.mxu0 %v176_v0  ;;  %169 = vmatprep.mubr.msk.bf16.mxu0 %vm69_vm0, %v180_v3 }
   0x4   :  { %163 = vmatprep.subr.bf16.mxu0 %v177_v1 }
   0x5   :  { %8 = vsyncpa [#allocation3], 0  ;;  %v179_v4 = vld [vmem:[%s263_s1 + $0x18] sm:$0xff]   ;;  %v181_v5 = vld [vmem:[%s262_s0 + $0x8] sm:$0xff]   ;;  %vm125_vm1 = vcmask 261120   ;;  %s206_s26 = smov [#allocation2]  }
   0x6   :  { %v146_v6 = vld [vmem:[%s264_s2] ss:$0 sm:$0xff]  ;;  %s135_s27 = sshll.u32 %s206_s26, 4  ;;  %s136_s27 = int_to_ptr.vmem [resolvable:$true] %s135_s27 }
   0x7   :  { %164 = vmatpush3.bf16.msra.mxu0 %v177_v1  ;;  %s182_s0 = scalar_lea.vmem %s136_s27, 512  ;;  %p187_p1 = scmp.lt.s32.totalorder %s136_s27, %s136_s27 }
   0x8   :  { %165 = vmatprep.subr.bf16.mxu0 %v178_v2  ;;  %p183_p0 = scmp.ne.s32.totalorder %s136_s27, %s182_s0  ;;  %p188_p2 = scmp.lt.s32.totalorder %s182_s0, %s182_s0 }
   0xa   :  { %p189_p3 = por %p188_p2, %p187_p1 }
   0xb   :  { %166 = vmatpush3.bf16.msra.mxu0 %v178_v2 }
   0xc   :  { %167 = vmatprep.subr.bf16.mxu0 %v179_v4  ;;  %p190_p4 = pnand %p189_p3, %p183_p0 }
   0xf   :  { %168 = vmatpush3.bf16.msra.mxu0 %v179_v4 }
  0x12   :  { %170 = vmatmul.mubr.msk.bf16.vlgmr.msra.gmra.mrb[0].mxu0 %vm69_vm0, %v181_v5 }
  0xe5   :  { %v171_v7 = vpop.f32.mrb[0].mxu0 }
  0xe6   :  { %v119_v8 = vadd.f32 %v171_v7, %v146_v6  ;;  %v110_v9 = vpop.f32.mrb[1].mxu0 }
  0xe7   :  { %v111_v10 = vadd.f32 %v146_v6, %v110_v9  ;;  %v172_v11 = vpop.f32.mrb[2].mxu0 }
  0xe8   :  { %128 = vst.msk [vmem:[#allocation2 + $0x10] sm:$0xff] %vm125_vm1, %v119_v8  ;;  %v122_v12 = vadd.f32 %v172_v11, %v146_v6  ;;  %v113_v13 = vpop.f32.mrb[3].mxu0 }
  0xe9   :  { %126 = vst.msk [vmem:[#allocation2] sm:$0xff] %vm125_vm1, %v111_v10  ;;  %v114_v14 = vadd.f32 %v146_v6, %v113_v13 }
  0xea   :  { %129 = vst.msk [vmem:[#allocation2 + $0x18] sm:$0xff] %vm125_vm1, %v122_v12 }
  0xeb   :  { %127 = vst.msk [vmem:[#allocation2 + $0x8] sm:$0xff] %vm125_vm1, %v114_v14 }
  0xec   :  { %193 = shalt.err (!%p190_p4)
}
  0xed   :  { %s194_s28 = scalar_lea.hbm %s265_s3, 512 }
  0xee   :  { %p195_p5 = scmp.ne.s32.totalorder %s265_s3, %s194_s28  ;;  %p198_p6 = scmp.lt.u32.totalorder %s194_s28, %s265_s3 }
  0xf0   :  { %p200_p7 = pnand %p198_p6, %p195_p5 }
  0xf2   :  { %203 = shalt.err (!%p200_p7)
}
  0xf3   :  { %s207_s6 = smov 128   ;;  %s208_s7 = smov 8  }
  0xf4   :  { %141 = dma.vmem_to_hbm [thread:$0]  %s136_s27, 512, %s265_s3, [#allocation3], %s207_s6, %s207_s6, %s208_s7  }
  0xf5   :  { %204 = dma.done.wait [#allocation3], 512  }
  0xf6   :  { %205 = vsyncadd [#allocation3], 4294966784 }
  0xf7   :  { %145 = vsyncpa [#allocation3], 1 }

</bundles_post_ra>
